<compile_context>
chip_gen: v5e
topology: v5e:2x2
jax: 0.10.0
libtpu: 0.0.40
codegen_flags: <defaults>
</compile_context>

<pallas_src>
import functools

import jax
import jax.numpy as jnp
from jax.experimental import pallas as pl
from jax.experimental.pallas import tpu as pltpu


def _focal_loss_kernel(x_ref, t_ref, o_ref, *, gamma, tail_rows):
    x = x_ref[...]                            # (tile_n, C), native dtype
    t = t_ref[...]                            # (tile_n, 1), int32

    # gather(1, targets) via one-hot masked row-reduce on the *raw* logits
    # (exact even in bf16: only one non-zero per row).
    col = jax.lax.broadcasted_iota(jnp.int32, x.shape, 1)
    g_x = jnp.sum(jnp.where(col == t, x, jnp.zeros_like(x)),
                  axis=1, keepdims=True).astype(jnp.float32)   # target logit

    # Stable logsumexp; only this path is widened to f32.
    m = jnp.max(x, axis=1, keepdims=True).astype(jnp.float32)
    x32 = x.astype(jnp.float32)
    lse = m + jnp.log(jnp.sum(jnp.exp(x32 - m), axis=1, keepdims=True))

    g_lp = g_x - lse                          # log p_target
    g_p = jnp.exp(g_lp)                       # p_target
    one_minus_p = 1.0 - g_p
    if gamma == 2.0:                          # default: one VPU multiply
        w = one_minus_p * one_minus_p
    elif float(gamma).is_integer() and 1.0 <= gamma <= 4.0:
        w = one_minus_p
        for _ in range(int(gamma) - 1):
            w = w * one_minus_p
    else:                                     # clamp: rounding can give p > 1
        w = jnp.maximum(one_minus_p, 0.0) ** gamma
    core = w * g_lp                           # alpha/sign folded into wrapper scale

    if tail_rows == 0:
        o_ref[...] = jnp.full(o_ref.shape, jnp.sum(core), dtype=jnp.float32)
    else:
        last = pl.num_programs(0) - 1

        @pl.when(pl.program_id(0) != last)
        def _():
            o_ref[...] = jnp.full(o_ref.shape, jnp.sum(core), dtype=jnp.float32)

        @pl.when(pl.program_id(0) == last)
        def _():
            # Select (not multiply) so inf/NaN in the Pallas-padded tail rows
            # cannot propagate into the reduction.
            row = jax.lax.broadcasted_iota(jnp.int32, core.shape, 0)
            masked = jnp.where(row < tail_rows, core, 0.0)
            o_ref[...] = jnp.full(o_ref.shape, jnp.sum(masked), dtype=jnp.float32)


def _vmem_capacity_bytes():
    try:
        return int(pltpu.get_tpu_info().vmem_capacity_bytes)
    except Exception:
        return 64 * 1024 * 1024               # conservative (v7x-sized) fallback


def _pick_tile_n(n, c, itemsize, vmem_cap):
    """Rows per tile: fill ~45% of physical VMEM with 2 pipelined input
    buffers (native dtype) + ~3 f32-wide (tile_n, C) in-kernel temporaries,
    rounded to a multiple of 8, capped at the (8-padded) batch size."""
    per_row = c * (2 * itemsize + 3 * 4) + 2 * 4   # + double-buffered targets
    rows = int(vmem_cap * 0.45) // max(1, per_row)
    rows = max(8, (rows // 8) * 8)
    n_pad8 = ((n + 7) // 8) * 8
    return min(rows, n_pad8)


def focal_loss(inputs, targets, gamma=2.0, alpha=0.25, reduction="mean",
               tile_n=None):
    """inputs: (N, C) float32/bfloat16 logits; targets: (N,) int class indices.

    Returns the scalar focal loss ('mean' or 'sum' reduction).
    """
    if reduction not in ("mean", "sum"):
        # TODO(synk): reduction='none' (per-sample loss output) not implemented
        # in the Pallas path.
        raise NotImplementedError("focal_loss kernel supports 'mean'/'sum' only")
    if not isinstance(alpha, (float, int)):
        # TODO(synk): per-class alpha tensor (alpha[targets]) not implemented.
        raise NotImplementedError("focal_loss kernel supports float alpha only")

    N, C = inputs.shape
    t2d = targets.reshape(N, 1).astype(jnp.int32)

    vmem_cap = _vmem_capacity_bytes()
    if tile_n is None:
        tile_n = _pick_tile_n(N, C, inputs.dtype.itemsize, vmem_cap)
    tile_n = max(8, (int(tile_n) // 8) * 8)

    num_tiles = pl.cdiv(N, tile_n)
    tail_rows = N % tile_n                    # 0 => every tile is full

    kernel = functools.partial(_focal_loss_kernel,
                               gamma=float(gamma), tail_rows=int(tail_rows))

    # VMEM budget: double-buffered inputs + ~3 f32 temporaries + slack, capped
    # well below physical VMEM (<=48 MiB on 64 MiB chips, <=96 MiB on 128 MiB).
    need = (2 * tile_n * (C * inputs.dtype.itemsize + 4)
            + 3 * tile_n * C * 4 + (2 << 20))
    vmem_limit = int(min(int(vmem_cap * 0.75), max(16 << 20, need)))

    partials = pl.pallas_call(
        kernel,
        out_shape=jax.ShapeDtypeStruct((num_tiles, 8, 128), jnp.float32),
        grid=(num_tiles,),
        in_specs=[
            # If profiling shows exposed DMA on short steps (v7x), try
            # pipeline_mode=pl.Buffered(3) on the logits BlockSpec.
            pl.BlockSpec((tile_n, C), lambda i: (i, 0)),
            pl.BlockSpec((tile_n, 1), lambda i: (i, 0)),
        ],
        out_specs=pl.BlockSpec((1, 8, 128), lambda i: (i, 0, 0)),
        compiler_params=pltpu.CompilerParams(
            dimension_semantics=("parallel",),
            vmem_limit_bytes=vmem_limit),
    )(inputs, t2d)

    # Fold alpha, the sign and the mean normalization into one scalar factor.
    factor = (-float(alpha)) * ((1.0 / N) if reduction == "mean" else 1.0)
    return jnp.sum(partials[:, 0, 0]) * factor


if __name__ == "__main__":
    key = jax.random.PRNGKey(0)
    k_x, k_t = jax.random.split(key)

    def ref_focal(x, t, gamma=2.0, alpha=0.25, reduction="mean"):
        lp = jax.nn.log_softmax(x.astype(jnp.float32), axis=1)
        g_lp = jnp.take_along_axis(lp, t[:, None], axis=1)
        g_p = jnp.exp(g_lp)
        loss = -alpha * (1.0 - g_p) ** gamma * g_lp
        return jnp.mean(loss) if reduction == "mean" else jnp.sum(loss)

    # Small shape consistent with the module: batch=8, num_classes=32.
    N, C = 8, 32
    x = jax.random.normal(k_x, (N, C), dtype=jnp.float32)
    t = jax.random.randint(k_t, (N,), 0, C, dtype=jnp.int32)
    loss = jax.block_until_ready(focal_loss(x, t, gamma=2.0, alpha=0.25))
    ref = ref_focal(x, t)
    assert jnp.allclose(loss, ref, rtol=1e-5, atol=1e-6), (loss, ref)

    # Multi-tile + ragged tail path (un-padded inputs, pl.when-gated mask,
    # per-tile partial sums combined in the wrapper).
    N2, C2 = 20, 32
    x2 = jax.random.normal(k_x, (N2, C2), dtype=jnp.float32)
    t2 = jax.random.randint(k_t, (N2,), 0, C2, dtype=jnp.int32)
    loss2 = jax.block_until_ready(focal_loss(x2, t2, tile_n=8))
    ref2 = ref_focal(x2, t2)
    assert jnp.allclose(loss2, ref2, rtol=1e-5, atol=1e-6), (loss2, ref2)

    # 'sum' reduction.
    loss2s = jax.block_until_ready(focal_loss(x2, t2, reduction="sum", tile_n=8))
    ref2s = ref_focal(x2, t2, reduction="sum")
    assert jnp.allclose(loss2s, ref2s, rtol=1e-5, atol=1e-5), (loss2s, ref2s)

    # bf16 logits (halved HBM traffic); gather on raw bf16, math in f32;
    # non-integer gamma exercises the clamped pow path.
    N3, C3 = 16, 48
    x3 = jax.random.normal(k_x, (N3, C3), dtype=jnp.bfloat16)
    t3 = jax.random.randint(k_t, (N3,), 0, C3, dtype=jnp.int32)
    loss3 = jax.block_until_ready(focal_loss(x3, t3, gamma=1.5))
    ref3 = ref_focal(x3, t3, gamma=1.5)
    assert jnp.allclose(loss3, ref3, rtol=5e-4, atol=1e-5), (loss3, ref3)

    print("KERNEL_OK")
</pallas_src>

<mosaic_0001>
module attributes {stable_mosaic.version = 11 : i64} {
  func.func @_focal_loss_kernel(%arg0: i32, %arg1: memref<8x32xf32, #tpu.memory_space<vmem>>, %arg2: memref<8x1xi32, #tpu.memory_space<vmem>>, %arg3: memref<1x8x128xf32, #tpu.memory_space<vmem>>) attributes {dimension_semantics = [#tpu.dimension_semantics<parallel>], iteration_bounds = array<i64: 1>, scalar_prefetch = 0 : i64, scratch_operands = 0 : i64, tpu.core_type = #tpu.core_type<tc>, window_params = [{transform_indices = @transform_0, window_bounds = array<i64: 8, 32>}, {transform_indices = @transform_1, window_bounds = array<i64: 8, 1>}, {transform_indices = @transform_2, window_bounds = array<i64: 1, 8, 128>}]} {
    %c0 = arith.constant 0 : index
    %c0_0 = arith.constant 0 : index
    %0 = vector.load %arg1[%c0, %c0_0] : memref<8x32xf32, #tpu.memory_space<vmem>>, vector<8x32xf32>
    %c0_1 = arith.constant 0 : index
    %c0_2 = arith.constant 0 : index
    %1 = vector.load %arg2[%c0_1, %c0_2] : memref<8x1xi32, #tpu.memory_space<vmem>>, vector<8x1xi32>
    %2 = tpu.iota {dimensions = array<i32: 1>} : vector<8x32xi32>
    %3 = vector.broadcast %1 : vector<8x1xi32> to vector<8x32xi32>
    %4 = arith.cmpi eq, %2, %3 : vector<8x32xi32>
    %cst = arith.constant 0.000000e+00 : f32
    %5 = vector.broadcast %cst : f32 to vector<8x32xf32>
    %6 = arith.select %4, %0, %5 : vector<8x32xi1>, vector<8x32xf32>
    %cst_3 = arith.constant dense<0.000000e+00> : vector<8xf32>
    %7 = vector.multi_reduction <add>, %6, %cst_3 [1] : vector<8x32xf32> to vector<8xf32>
    %8 = vector.shape_cast %7 : vector<8xf32> to vector<8x1xf32>
    %cst_4 = arith.constant dense<0xFF800000> : vector<8xf32>
    %9 = vector.multi_reduction <maximumf>, %0, %cst_4 [1] : vector<8x32xf32> to vector<8xf32>
    %10 = vector.shape_cast %9 : vector<8xf32> to vector<8x1xf32>
    %11 = vector.broadcast %10 : vector<8x1xf32> to vector<8x32xf32>
    %12 = arith.subf %0, %11 : vector<8x32xf32>
    %13 = math.exp %12 : vector<8x32xf32>
    %cst_5 = arith.constant dense<0.000000e+00> : vector<8xf32>
    %14 = vector.multi_reduction <add>, %13, %cst_5 [1] : vector<8x32xf32> to vector<8xf32>
    %15 = vector.shape_cast %14 : vector<8xf32> to vector<8x1xf32>
    %16 = math.log %15 : vector<8x1xf32>
    %17 = arith.addf %10, %16 : vector<8x1xf32>
    %18 = arith.subf %8, %17 : vector<8x1xf32>
    %19 = math.exp %18 : vector<8x1xf32>
    %cst_6 = arith.constant 1.000000e+00 : f32
    %20 = vector.broadcast %cst_6 : f32 to vector<8x1xf32>
    %21 = arith.subf %20, %19 : vector<8x1xf32>
    %22 = arith.mulf %21, %21 : vector<8x1xf32>
    %23 = arith.mulf %22, %18 : vector<8x1xf32>
    %24 = vector.shape_cast %23 : vector<8x1xf32> to vector<1x8x1xf32>
    %cst_7 = arith.constant dense<0.000000e+00> : vector<1xf32>
    %25 = vector.multi_reduction <add>, %24, %cst_7 [1, 2] : vector<1x8x1xf32> to vector<1xf32>
    %26 = vector.shape_cast %25 : vector<1xf32> to vector<1x1x1xf32>
    %27 = vector.extract %26[0, 0, 0] : f32 from vector<1x1x1xf32>
    %28 = vector.broadcast %27 : f32 to vector<1x8x128xf32>
    %c0_8 = arith.constant 0 : index
    %c0_9 = arith.constant 0 : index
    %c0_10 = arith.constant 0 : index
    %29 = vector.load %arg3[%c0_8, %c0_9, %c0_10] : memref<1x8x128xf32, #tpu.memory_space<vmem>>, vector<1x8x128xf32>
    tpu.vector_store %arg3[%c0_8, %c0_9, %c0_10], %28 {strides = array<i32>} : memref<1x8x128xf32, #tpu.memory_space<vmem>>, vector<1x8x128xf32>,
    return
  }
  func.func @transform_0(%arg0: i32) -> (i32, i32) {
    %c0_i32 = arith.constant 0 : i32
    %c0_i32_0 = arith.constant 0 : i32
    return %arg0, %c0_i32 : i32, i32
  }
  func.func @transform_1(%arg0: i32) -> (i32, i32) {
    %c0_i32 = arith.constant 0 : i32
    %c0_i32_0 = arith.constant 0 : i32
    return %arg0, %c0_i32 : i32, i32
  }
  func.func @transform_2(%arg0: i32) -> (i32, i32, i32) {
    %c0_i32 = arith.constant 0 : i32
    %c0_i32_0 = arith.constant 0 : i32
    %c0_i32_1 = arith.constant 0 : i32
    return %arg0, %c0_i32, %c0_i32_0 : i32, i32, i32
  }
}

</mosaic_0001>

<bundles_post_ra>
// kernel: tpu_custom_call.1
= control target key start
LH: loop header
LB: loop body
LE: loop exit
PB: predicated region body
PF: predicated region fallthrough
CT: control target
= control target key end

     0   :  { %vm21_vm0 = vcmask 261120   ;;  %s138_s0 = inlined_call_operand.vmem [shape: f32[8,32], index: 0, kind: input, shape index: {}]   ;;  %s139_s1 = inlined_call_operand.vmem [shape: s32[8,1], index: 1, kind: input, shape index: {}]   ;;  %s140_s2 = inlined_call_operand.hbm [shape: f32[1,8,128], index: 2, kind: output, shape index: {}]  }
   0x1   :  { %v12_v0 = vld [vmem:[%s138_s0] sm:$0xff] }
   0x2   :  { %7 = vsyncpa [#allocation3], 0  ;;  %v25_v1 = vsel %vm21_vm0, %v12_v0, -inf  ;;  %v109_v2 = vmov 0   ;;  %v13_v3 = vld [vmem:[%s139_s1] sm:$0xff]  ;;  %v14_v9 = vlaneseq  ;;  %vm43_vm2 = vcmask 7168  }
   0x3   :  { %76 = vset.pattern.permute.xlu0 %v109_v2  ;;  %s110_s0 = smov [#allocation2]   ;;  %s63_s15 = sshll.u32 %s140_s2, 4  ;;  %s64_s15 = int_to_ptr.hbm [resolvable:$true] %s63_s15 }
   0x4   :  { %26 = vmax.xlane.f32.xlu0 %v25_v1  ;;  %v15_v10 = vand.u32 127, %v14_v9  ;;  %s61_s1 = sshll.u32 %s110_s0, 4  ;;  %s62_s1 = int_to_ptr.vmem [resolvable:$true] %s61_s1 }
  0x18   :  { %17 = vperm.xlu0 %76, %v13_v3  }
  0x77   :  { %v27_v4 = vpop.xlane.xlu0 %26 }
  0x78   :  { %v28_v5 = vsub.f32 %v12_v0, %v27_v4 }
  0x7a   :  { %v29_v6 = vmul.f32 1.442695, %v28_v5 }
  0x7c   :  { %77 = vpow2.f32 %v29_v6 }
  0x82   :  { %v78_v7 = vpop.eup %77 }
  0x83   :  { %v31_v8 = vsel %vm21_vm0, %v78_v7, 0.0 }
  0x84   :  { %32 = vadd.xlane.f32.xlu1 %v31_v8 }
  0x8a   :  { %v18_v11 = vpop.permute.xlu0 %17 }
  0x8b   :  { %vm19_vm1 = vcmp.eq.s32.totalorder %v15_v10, %v18_v11 }
  0x8c   :  { %v20_v12 = vsel %vm19_vm1, %v12_v0, 0.0 }
  0x8d   :  { %v22_v13 = vsel %vm21_vm0, %v20_v12, 0.0 }
  0x8e   :  { %23 = vadd.xlane.f32.xlu1 %v22_v13 }
  0xf7   :  { %v33_v14 = vpop.xlane.xlu1 %32 }
  0xf8   :  { %79 = vlog2.f32 %v33_v14 }
  0xfe   :  { %v80_v15 = vpop.eup %79 }
  0xff   :  { %v35_v16 = vmul.f32 0.6931472, %v80_v15 }
 0x101   :  { %v36_v17 = vadd.f32 %v35_v16, %v27_v4  ;;  %v24_v18 = vpop.xlane.xlu1 %23 }
 0x103   :  { %v37_v19 = vsub.f32 %v24_v18, %v36_v17 }
 0x105   :  { %v38_v20 = vmul.f32 1.442695, %v37_v19 }
 0x107   :  { %81 = vpow2.f32 %v38_v20 }
 0x10d   :  { %v82_v21 = vpop.eup %81 }
 0x10e   :  { %v40_v22 = vsub.f32 1.0, %v82_v21 }
 0x110   :  { %v41_v23 = vmul.f32 %v40_v22, %v40_v22 }
 0x112   :  { %v42_v24 = vmul.f32 %v41_v23, %v37_v19 }
 0x114   :  { %v44_v25 = vsel %vm43_vm2, %v42_v24, 0.0 }
 0x115   :  { %45 = vadd.xlane.f32.xlu2 %v44_v25 }
 0x188   :  { %v46_v26 = vpop.xlane.xlu2 %45 }
 0x189   :  { %v47_v27 = vrot.slane %v46_v26, 4 }
 0x18b   :  { %v48_v28 = vadd.f32 %v47_v27, %v46_v26 }
 0x18d   :  { %v49_v29 = vrot.slane %v48_v28, 2 }
 0x18f   :  { %v50_v30 = vadd.f32 %v49_v29, %v48_v28 }
 0x191   :  { %v51_v31 = vrot.slane %v50_v30, 1 }
 0x193   :  { %v52_v32 = vadd.f32 %v51_v31, %v50_v30 }
 0x195   :  { %72 = vpush %v52_v32 }
 0x1c6   :  { %s73_s16 = spop %72 }
 0x1c7   :  { %v54_v33 = vstv %s73_s16 }
 0x1c8   :  { %55 = vst [vmem:[#allocation2] sm:$0xff] %v54_v33 }
 0x1c9   :  { %66 = dma.vmem_to_hbm [thread:$0]  %s62_s1, 128, %s64_s15, [#allocation3]  }
 0x1ca   :  { %107 = dma.done.wait [#allocation3], 128  }
 0x1cb   :  { %108 = vsyncadd [#allocation3], 4294967168 }
 0x1cc   :  { %71 = vsyncpa [#allocation3], 1 }

</bundles_post_ra>
